<compile_context>
chip_gen: v5e
topology: v5e:2x2
jax: 0.10.0
libtpu: 0.0.40
codegen_flags: <defaults>
</compile_context>

<pallas_src>
import jax
import jax.numpy as jnp
from jax.experimental import pallas as pl
from jax.experimental.pallas import tpu as pltpu

_LANE = 128     # lane width: last-dim multiple for dense MXU use / unmasked stores
_SUBLANE = 8    # f32 sublane multiple for the second-to-last dim


def _round_up(n: int, m: int) -> int:
    return ((n + m - 1) // m) * m


def encoder_kernel(x_ref, w1_ref, b1_ref, w2_ref, b2_ref, o_ref):
    # Layer 1: bf16 matmul on the MXU, f32 accumulate; bias + ReLU in f32.
    h = jnp.dot(x_ref[...], w1_ref[...], preferred_element_type=jnp.float32)
    h = jnp.maximum(h + b1_ref[...], 0.0)
    # Layer 2: cast the activation to bf16 so the second matmul also runs at
    # MXU bf16 peak; accumulate in f32.
    y = jnp.dot(h.astype(w2_ref.dtype), w2_ref[...],
                preferred_element_type=jnp.float32)
    y = jnp.maximum(y + b2_ref[...], 0.0)
    o_ref[...] = y.astype(o_ref.dtype)


def encoder_forward(x, w1, b1, w2, b2, *, tile_b=None):
    """Fused Encoder forward: relu(relu(x @ w1.T + b1) @ w2.T + b2).

    Args (torch nn.Linear layout):
      x:  (B, D_in)     activations (any float dtype; compute runs in bf16).
      w1: (H, D_in)     linear1.weight
      b1: (H,)          linear1.bias
      w2: (D_out, H)    linear2.weight
      b2: (D_out,)      linear2.bias
    Returns:
      (B, D_out) float32.
    """
    B, D_in = x.shape
    H = w1.shape[0]
    D_out = w2.shape[0]

    # --- batch tile: multiple of 8, default 256 (per-step overhead ~0.35us) ---
    if tile_b is None:
        tile_b = 256
    tile_b = max(_SUBLANE,
                 _round_up(min(tile_b, _round_up(B, _SUBLANE)), _SUBLANE))

    # --- lane-align feature dims; pad batch to a tile multiple ----------------
    # (Padding with zeros is exact: zero bias/weight columns stay zero through
    #  ReLU and contribute nothing to the next matmul; padded rows/cols are
    #  sliced off at the end.)
    B_p = _round_up(B, tile_b)
    D_in_p = _round_up(D_in, _LANE)
    # Note: on v6e/v7x padding K/N to multiples of 256 fills full 2x256x256
    # MXU passes; 128 is the minimum lane-dense alignment used here.
    H_p = _round_up(H, _LANE)
    D_out_p = _round_up(D_out, _LANE)

    compute_dtype = jnp.bfloat16

    x_p = jnp.zeros((B_p, D_in_p), compute_dtype).at[:B, :D_in].set(
        x.astype(compute_dtype))
    # Pre-transpose to (in, out) layout so the kernel computes y = x @ W + b.
    w1_p = jnp.zeros((D_in_p, H_p), compute_dtype).at[:D_in, :H].set(
        w1.T.astype(compute_dtype))
    w2_p = jnp.zeros((H_p, D_out_p), compute_dtype).at[:H, :D_out].set(
        w2.T.astype(compute_dtype))
    b1_p = jnp.zeros((1, H_p), jnp.float32).at[0, :H].set(
        b1.astype(jnp.float32))
    b2_p = jnp.zeros((1, D_out_p), jnp.float32).at[0, :D_out].set(
        b2.astype(jnp.float32))

    grid = (B_p // tile_b,)

    cost = pl.CostEstimate(
        flops=2 * B_p * (D_in_p * H_p + H_p * D_out_p),
        transcendentals=0,
        bytes_accessed=(x_p.size * 2 + w1_p.size * 2 + w2_p.size * 2
                        + b1_p.size * 4 + b2_p.size * 4
                        + B_p * D_out_p * 4),
    )

    out_p = pl.pallas_call(
        encoder_kernel,
        out_shape=jax.ShapeDtypeStruct((B_p, D_out_p), jnp.float32),
        grid_spec=pltpu.PrefetchScalarGridSpec(
            num_scalar_prefetch=0,
            grid=grid,
            in_specs=[
                pl.BlockSpec((tile_b, D_in_p), lambda i: (i, 0)),   # x tile
                pl.BlockSpec((D_in_p, H_p), lambda i: (0, 0)),      # W1^T (resident)
                pl.BlockSpec((1, H_p), lambda i: (0, 0)),           # b1 (resident)
                pl.BlockSpec((H_p, D_out_p), lambda i: (0, 0)),     # W2^T (resident)
                pl.BlockSpec((1, D_out_p), lambda i: (0, 0)),       # b2 (resident)
            ],
            out_specs=pl.BlockSpec((tile_b, D_out_p), lambda i: (i, 0)),
        ),
        compiler_params=pltpu.CompilerParams(
            dimension_semantics=("parallel",),
        ),
        cost_estimate=cost,
    )(x_p, w1_p, b1_p, w2_p, b2_p)

    return out_p[:B, :D_out]


def encoder_ref(x, w1, b1, w2, b2):
    h = jnp.maximum(x @ w1.T + b1, 0.0)
    return jnp.maximum(h @ w2.T + b2, 0.0)


if __name__ == "__main__":
    # Small shapes consistent with Encoder(D_in, H, D_out); batch is big enough
    # that the default tile_b=256 yields >= 2 grid steps (pipelining / 2 TCs).
    B, D_in, H, D_out = 512, 32, 64, 16

    key = jax.random.PRNGKey(0)
    kx, kw1, kb1, kw2, kb2 = jax.random.split(key, 5)

    x = jax.random.normal(kx, (B, D_in), dtype=jnp.float32)

    # torch.nn.Linear-style init: U(-1/sqrt(fan_in), 1/sqrt(fan_in)), torch layout.
    lim1 = 1.0 / float(D_in) ** 0.5
    lim2 = 1.0 / float(H) ** 0.5
    w1 = jax.random.uniform(kw1, (H, D_in), jnp.float32, -lim1, lim1)
    b1 = jax.random.uniform(kb1, (H,), jnp.float32, -lim1, lim1)
    w2 = jax.random.uniform(kw2, (D_out, H), jnp.float32, -lim2, lim2)
    b2 = jax.random.uniform(kb2, (D_out,), jnp.float32, -lim2, lim2)

    out = encoder_forward(x, w1, b1, w2, b2)
    out = jax.block_until_ready(out)

    ref = encoder_ref(x, w1, b1, w2, b2)
    assert out.shape == (B, D_out)
    # bf16 inputs/weights with f32 accumulation -> loosened tolerance vs the
    # pure-f32 reference.
    max_err = float(jnp.max(jnp.abs(out - ref)))
    assert jnp.allclose(out, ref, atol=5e-2, rtol=5e-2), (
        f"mismatch vs reference, max abs err = {max_err}")

    print("KERNEL_OK")
</pallas_src>

<mosaic_0001>
module attributes {stable_mosaic.version = 11 : i64} {
  func.func @encoder_kernel(%arg0: i32, %arg1: memref<256x128xbf16, #tpu.memory_space<vmem>>, %arg2: memref<128x128xbf16, #tpu.memory_space<vmem>>, %arg3: memref<1x128xf32, #tpu.memory_space<vmem>>, %arg4: memref<128x128xbf16, #tpu.memory_space<vmem>>, %arg5: memref<1x128xf32, #tpu.memory_space<vmem>>, %arg6: memref<256x128xf32, #tpu.memory_space<vmem>>) attributes {dimension_semantics = [#tpu.dimension_semantics<parallel>], iteration_bounds = array<i64: 2>, scalar_prefetch = 0 : i64, scratch_operands = 0 : i64, tpu.core_type = #tpu.core_type<tc>, window_params = [{transform_indices = @transform_0, window_bounds = array<i64: 256, 128>}, {pipeline_mode = #tpu.pipeline_mode<synchronous>, transform_indices = @transform_1, window_bounds = array<i64: 128, 128>}, {pipeline_mode = #tpu.pipeline_mode<synchronous>, transform_indices = @transform_2, window_bounds = array<i64: 1, 128>}, {pipeline_mode = #tpu.pipeline_mode<synchronous>, transform_indices = @transform_3, window_bounds = array<i64: 128, 128>}, {pipeline_mode = #tpu.pipeline_mode<synchronous>, transform_indices = @transform_4, window_bounds = array<i64: 1, 128>}, {transform_indices = @transform_5, window_bounds = array<i64: 256, 128>}]} {
    %c0 = arith.constant 0 : index
    %c0_0 = arith.constant 0 : index
    %0 = vector.load %arg1[%c0, %c0_0] : memref<256x128xbf16, #tpu.memory_space<vmem>>, vector<256x128xbf16>
    %c0_1 = arith.constant 0 : index
    %c0_2 = arith.constant 0 : index
    %1 = vector.load %arg2[%c0_1, %c0_2] : memref<128x128xbf16, #tpu.memory_space<vmem>>, vector<128x128xbf16>
    %cst = arith.constant dense<0.000000e+00> : vector<256x128xf32>
    %2 = tpu.matmul %0, %1, %cst {dimension_numbers = #tpu.dot_dimension_numbers<[1], [0], [0], [1], [0, 0, 1, 1], [], []>} : vector<256x128xbf16>, vector<128x128xbf16>, vector<256x128xf32> -> vector<256x128xf32>
    %c0_3 = arith.constant 0 : index
    %c0_4 = arith.constant 0 : index
    %3 = vector.load %arg3[%c0_3, %c0_4] : memref<1x128xf32, #tpu.memory_space<vmem>>, vector<1x128xf32>
    %4 = vector.broadcast %3 : vector<1x128xf32> to vector<256x128xf32>
    %5 = arith.addf %2, %4 : vector<256x128xf32>
    %cst_5 = arith.constant 0.000000e+00 : f32
    %6 = vector.broadcast %cst_5 : f32 to vector<256x128xf32>
    %7 = arith.maximumf %5, %6 : vector<256x128xf32>
    %8 = arith.truncf %7 : vector<256x128xf32> to vector<256x128xbf16>
    %c0_6 = arith.constant 0 : index
    %c0_7 = arith.constant 0 : index
    %9 = vector.load %arg4[%c0_6, %c0_7] : memref<128x128xbf16, #tpu.memory_space<vmem>>, vector<128x128xbf16>
    %cst_8 = arith.constant dense<0.000000e+00> : vector<256x128xf32>
    %10 = tpu.matmul %8, %9, %cst_8 {dimension_numbers = #tpu.dot_dimension_numbers<[1], [0], [0], [1], [0, 0, 1, 1], [], []>} : vector<256x128xbf16>, vector<128x128xbf16>, vector<256x128xf32> -> vector<256x128xf32>
    %c0_9 = arith.constant 0 : index
    %c0_10 = arith.constant 0 : index
    %11 = vector.load %arg5[%c0_9, %c0_10] : memref<1x128xf32, #tpu.memory_space<vmem>>, vector<1x128xf32>
    %12 = vector.broadcast %11 : vector<1x128xf32> to vector<256x128xf32>
    %13 = arith.addf %10, %12 : vector<256x128xf32>
    %cst_11 = arith.constant 0.000000e+00 : f32
    %14 = vector.broadcast %cst_11 : f32 to vector<256x128xf32>
    %15 = arith.maximumf %13, %14 : vector<256x128xf32>
    %c0_12 = arith.constant 0 : index
    %c0_13 = arith.constant 0 : index
    %16 = vector.load %arg6[%c0_12, %c0_13] : memref<256x128xf32, #tpu.memory_space<vmem>>, vector<256x128xf32>
    tpu.vector_store %arg6[%c0_12, %c0_13], %15 {strides = array<i32>} : memref<256x128xf32, #tpu.memory_space<vmem>>, vector<256x128xf32>,
    return
  }
  func.func @transform_0(%arg0: i32) -> (i32, i32) {
    %c0_i32 = arith.constant 0 : i32
    %c0_i32_0 = arith.constant 0 : i32
    return %arg0, %c0_i32 : i32, i32
  }
  func.func @transform_1(%arg0: i32) -> (i32, i32) {
    %c0_i32 = arith.constant 0 : i32
    %c0_i32_0 = arith.constant 0 : i32
    %c0_i32_1 = arith.constant 0 : i32
    return %c0_i32, %c0_i32_0 : i32, i32
  }
  func.func @transform_2(%arg0: i32) -> (i32, i32) {
    %c0_i32 = arith.constant 0 : i32
    %c0_i32_0 = arith.constant 0 : i32
    %c0_i32_1 = arith.constant 0 : i32
    return %c0_i32, %c0_i32_0 : i32, i32
  }
  func.func @transform_3(%arg0: i32) -> (i32, i32) {
    %c0_i32 = arith.constant 0 : i32
    %c0_i32_0 = arith.constant 0 : i32
    %c0_i32_1 = arith.constant 0 : i32
    return %c0_i32, %c0_i32_0 : i32, i32
  }
  func.func @transform_4(%arg0: i32) -> (i32, i32) {
    %c0_i32 = arith.constant 0 : i32
    %c0_i32_0 = arith.constant 0 : i32
    %c0_i32_1 = arith.constant 0 : i32
    return %c0_i32, %c0_i32_0 : i32, i32
  }
  func.func @transform_5(%arg0: i32) -> (i32, i32) {
    %c0_i32 = arith.constant 0 : i32
    %c0_i32_0 = arith.constant 0 : i32
    return %arg0, %c0_i32 : i32, i32
  }
}

</mosaic_0001>

<bundles_post_ra>
// kernel: tpu_custom_call.1
= control target key start
LH: loop header
LB: loop body
LE: loop exit
PB: predicated region body
PF: predicated region fallthrough
CT: control target
= control target key end

     0   :  { %10 = vsyncpa [#allocation3], 0  ;;  %s1687_s0 = inlined_call_operand.hbm [shape: bf16[512,128], index: 0, kind: input, shape index: {}]   ;;  %s1688_s1 = inlined_call_operand.hbm [shape: bf16[128,128], index: 1, kind: input, shape index: {}]   ;;  %s1689_s2 = inlined_call_operand.vmem [shape: f32[1,128], index: 2, kind: input, shape index: {}]   ;;  %s1690_s3 = inlined_call_operand.hbm [shape: bf16[128,128], index: 3, kind: input, shape index: {}]   ;;  %s1691_s4 = inlined_call_operand.vmem [shape: f32[1,128], index: 4, kind: input, shape index: {}]   ;;  %s1692_s5 = inlined_call_operand.hbm [shape: f32[512,128], index: 5, kind: output, shape index: {}]  }
   0x1   :  { %12 = vsyncpa [#allocation3 + $0x1], 0 }
   0x2   :  { %13 = vsyncpa [#allocation6], 0 }
   0x3   :  { %14 = vsyncpa [#allocation4], 0 }
   0x4   :  { %16 = vsyncpa [#allocation4 + $0x1], 0  ;;  %s1409_s18 = smov 0   ;;  %s1411_s19 = smov 0  }
   0x5   :  { %s1413_s20 = smov 0   ;;  %s1415_s21 = smov 0  }
   0x6 LB: > { %s1430_s22 = sadd.s32 4294967295, %s1371_s21   ;;  %s942_s23 = sadd.s32 4294967294, %s1371_s21   ;;  %s1371_s21 = sphi %s1415_s21, %s1704_s21   ;;  %s1367_s20 = sphi %s1413_s20, %s1703_s20   ;;  %s1363_s19 = sphi %s1411_s19, %s1702_s19   ;;  %s1359_s18 = sphi %s1409_s18, %s1701_s18  }
   0x7   : > { %p42_p0 = scmp.ne.s32.totalorder %s1363_s19, %s1359_s18  ;;  %p43_p1 = scmp.eq.s32.totalorder %s1430_s22, 0 }
   0x8   : > { %p150_p2 = scmp.eq.s32.totalorder %s1430_s22, 1  ;;  %p156_p3 = scmp.eq.s32.totalorder %s942_s23, 1 }
   0x9   : > { %p1439_p4 = por %p43_p1, %p42_p0  ;;  %p943_p5 = scmp.ge.s32.totalorder %s1371_s21, 1 }
   0xa   : > { %p1444_p6 = por %p156_p3, %p42_p0  ;;  %p163_p7 = scmp.lt.s32.totalorder %s1371_s21, 3 }
   0xb   : > { %s174_s28 = sshll.u32 %s1688_s1, 4  ;;  %s1373_s30 = smov [#allocation5]   ;;  %s175_s28 = int_to_ptr.hbm [resolvable:$true] %s174_s28 }
   0xc   : > { %p1452_p8 = pnand %p943_p5, %p163_p7  ;;  %s176_s6 = sshll.u32 %s1373_s30, 4  ;;  %s177_s6 = int_to_ptr.vmem [resolvable:$true] %s176_s6 }
   0xd   : > { %s191_s9 = sshll.u32 %s1690_s3, 4  ;;  %s1693_s10 = smov 64   ;;  %s192_s9 = int_to_ptr.hbm [resolvable:$true] %s191_s9 }
   0xe   : > { %p1150_p9 = pneg %p1452_p8  ;;  %s1375_s11 = smov 4  }
   0xf   : > { %s1376_s12 = smov [#allocation7]   ;;  %s1471_s14 = sadd.s32 1, %s1371_s21  }
  0x10   : > { %p1151_p10 = pnand %p1150_p9, %p43_p1  ;;  %s193_s13 = sshll.u32 %s1376_s12, 4  ;;  %s194_s13 = int_to_ptr.vmem [resolvable:$true] %s193_s13 }
  0x11   : > { %s29_s15 = sadd.s32 1, %s1367_s20  ;;  %s26_s16 = ssub.s32 %s1371_s21, %s1471_s14 }
  0x12   : > { %1153 = dma.hbm_to_vmem [thread:$0]  (!%p1151_p10), %s175_s28, 1024, %s177_s6, [#allocation6], %s1693_s10, %s1693_s10, %s1375_s11  }
  0x13   : > { %1156 = dma.hbm_to_vmem [thread:$0]  (!%p1151_p10), %s192_s9, 1024, %s194_s13, [#allocation6], %s1693_s10, %s1693_s10, %s1375_s11  }
  0x14   : > { %p36_p12 = scmp.ne.s32.totalorder %s1367_s20, %s1363_s19  ;;  %p27_p13 = scmp.eq.s32.totalorder %s26_s16, 0 }
  0x15   : > { %p37_p0 = scmp.eq.s32.totalorder %s1371_s21, 0  ;;  %p1167_p5 = scmp.lt.s32.totalorder %s1371_s21, 2 }
  0x16   : > { %p1481_p3 = por %p150_p2, %p36_p12  ;;  %s210_s26 = sand.u32 1, %s1367_s20  }
  0x17   : > { %s1487_s23 = scalar_select %p27_p13, %s1367_s20, %s29_s15  }
  0x18   : > { %p38_p7 = por %p37_p0, %p36_p12  ;;  %s947_s27 = sshll.u32 %s210_s26, 7 }
  0x19   : > { %s1088_s28 = sshll.u32 %s1371_s21, 7  ;;  %s214_s8 = scalar_lea.vmem [#allocation2], %s947_s27 }
  0x1a   : > { %s219_s7 = scalar_lea.hbm %s1687_s0, %s1088_s28  ;;  %s222_s9 = sshll.u32 %s214_s8, 4  ;;  %s223_s9 = int_to_ptr.vmem [resolvable:$true] %s222_s9 }
  0x1b   : > { %s220_s12 = sshll.u32 %s219_s7, 4  ;;  %p1494_p2 = pnand %p1167_p5, %p38_p7  ;;  %s221_s12 = int_to_ptr.hbm [resolvable:$true] %s220_s12 }
  0x1c   : > { %s211_s15 = scalar_lea.sflag [#allocation3], %s210_s26  ;;  %s1271_s16 = sshra.s32 %s221_s12, 4  ;;  %s1272_s16 = int_to_ptr.hbm [resolvable:$true] %s1271_s16 }
  0x1d   : > { %s1273_s10 = scalar_lea.hbm %s1272_s16, 128  ;;  %p1275_p10 = pneg %p1494_p2 }
  0x1e   : > { %p1274_p9 = scmp.ne.s32.totalorder %s1272_s16, %s1273_s10  ;;  %s1278_s30 = scalar_lea.hbm %s1687_s0, 256 }
  0x1f   : > { %p1279_p0 = scmp.lt.s32.totalorder %s1272_s16, %s1687_s0  ;;  %p1280_p5 = scmp.lt.s32.totalorder %s1278_s30, %s1273_s10 }
  0x20   : > { %p1276_p12 = pnand %p1275_p10, %p1274_p9 }
  0x21   : > { %p1281_p7 = por %p1280_p5, %p1279_p0 }
  0x22   : > { %p1277_p13 = pneg %p1276_p12 }
  0x24   : > { %p1282_p11 = pnand %p1281_p7, %p1277_p13 }
  0x26   : > { %1285 = shalt.err (!%p1282_p11)
}
  0x27   : > { %s1699_s26 = smov 64   ;;  %234 = sbr.rel (%p1452_p8) target bundleno = 485 (0x1e5), region = 40 }
  0x28   : > { %1160 = dma.hbm_to_vmem [thread:$0]  (!%p1494_p2), %s221_s12, 2048, %s223_s9, %s211_s15, %s1699_s26, %s1699_s26, %s1375_s11  }
  0x29   : > { %s1514_s8 = sand.u32 (!%p1452_p8), 1, %s1363_s19  }
  0x2a   : > { %s951_s16 = sshll.u32 (!%p1452_p8), %s1514_s8, 7  ;;  %s237_s10 = scalar_lea.sflag (!%p1452_p8), [#allocation3], %s1514_s8 }
  0x2b   : > { %s1518_s28 = scalar_lea.vmem (!%p1452_p8), [#allocation2], %s951_s16 }
  0x2c   : > { %1346 = dma.done.wait (%p1439_p4), %s237_s10, 2048  }
  0x2d   : > { %1348 = vsyncadd (%p1439_p4), %s237_s10, 4294965248 }
  0x2e   : > { %1350 = dma.done.wait (%p43_p1), [#allocation6], 2048  }
  0x2f   : > { %1352 = vsyncadd (%p43_p1), [#allocation6], 4294965248  ;;  %v1112_v0 = vld [vmem:[#allocation5 + $0x38] sm:$0xff]  ;;  %v1111_v1 = vld [vmem:[#allocation5 + $0x30] sm:$0xff]  ;;  %s954_s12 = sshll.u32 %s1514_s8, 8  ;;  %s1121_s15 = sshll.u32 %s1430_s22, 8 }
  0x30   : > { %476 = vmatpush.bf16.msra.mxu0 %v1112_v0  ;;  %1122 = vmatpush.bf16.msra.mxu2 %v1112_v0  ;;  %v1110_v2 = vld [vmem:[#allocation5 + $0x28] sm:$0xff]  ;;  %v1109_v3 = vld [vmem:[#allocation5 + $0x20] sm:$0xff]  ;;  %v1108_v4 = vld [vmem:[#allocation5 + $0x18] sm:$0xff]  ;;  %s1588_s13 = scalar_lea.vmem [#allocation8], %s954_s12  ;;  %s846_s6 = scalar_lea.hbm %s1692_s5, %s1121_s15 }
  0x31   : > { %v1107_v5 = vld [vmem:[#allocation5 + $0x10] sm:$0xff]  ;;  %v1106_v6 = vld [vmem:[#allocation5 + $0x8] sm:$0xff]  ;;  %v1105_v7 = vld [vmem:[#allocation5] sm:$0xff]  ;;  %s847_s7 = sshll.u32 %s1588_s13, 4  ;;  %s849_s26 = sshll.u32 %s846_s6, 4  ;;  %s848_s7 = int_to_ptr.vmem [resolvable:$true] %s847_s7  ;;  %s850_s26 = int_to_ptr.hbm [resolvable:$true] %s849_s26 }
  0x32   : > { %v1089_v8 = vld [vmem:[%s1518_s28] sm:$0xff]  ;;  %v1090_v10 = vld [vmem:[%s1518_s28 + $0x8] sm:$0xff]  ;;  %v1091_v12 = vld [vmem:[%s1518_s28 + $0x10] sm:$0xff]  ;;  %s835_s16 = scalar_lea.sflag [#allocation4], %s1514_s8  ;;  %s1315_s10 = sshra.s32 %s850_s26, 4  ;;  %s1316_s10 = int_to_ptr.hbm [resolvable:$true] %s1315_s10 }
  0x33   : > { %v1097_v9 = vld [vmem:[%s1518_s28 + $0x40] sm:$0xff]  ;;  %v1098_v11 = vld [vmem:[%s1518_s28 + $0x48] sm:$0xff]  ;;  %v1099_v13 = vld [vmem:[%s1518_s28 + $0x50] sm:$0xff]  ;;  %s1317_s22 = scalar_lea.hbm %s1316_s10, 256  ;;  %s1321_s29 = scalar_lea.hbm %s1692_s5, 512 }
  0x34   : > { %477 = vmatpush.bf16.msra.mxu0 %v1111_v1  ;;  %1123 = vmatpush.bf16.msra.mxu2 %v1111_v1  ;;  %v1092_v14 = vld [vmem:[%s1518_s28 + $0x18] sm:$0xff]  ;;  %v1093_v16 = vld [vmem:[%s1518_s28 + $0x20] sm:$0xff]  ;;  %v1094_v19 = vld [vmem:[%s1518_s28 + $0x28] sm:$0xff]  ;;  %p1318_p1 = scmp.ne.s32.totalorder %s1316_s10, %s1317_s22  ;;  %p1322_p11 = scmp.lt.s32.totalorder %s1316_s10, %s1692_s5 }
  0x35   : > { %v1100_v15 = vld [vmem:[%s1518_s28 + $0x58] sm:$0xff]  ;;  %v1101_v17 = vld [vmem:[%s1518_s28 + $0x60] sm:$0xff]  ;;  %v1102_v20 = vld [vmem:[%s1518_s28 + $0x68] sm:$0xff]  ;;  %p1323_p2 = scmp.lt.s32.totalorder %s1321_s29, %s1317_s22 }
  0x36   : > { %v1120_v18 = vld [vmem:[#allocation7 + $0x38] sm:$0xff]  ;;  %v1119_v21 = vld [vmem:[#allocation7 + $0x30] sm:$0xff]  ;;  %v1118_v22 = vld [vmem:[#allocation7 + $0x28] sm:$0xff]  ;;  %p1319_p4 = pnand %p1318_p1, %p1481_p3 }
  0x37   : > { %681 = vmatpush.bf16.msra.mxu1 %v1120_v18  ;;  %1130 = vmatpush.bf16.msra.mxu3 %v1120_v18  ;;  %v1117_v23 = vld [vmem:[#allocation7 + $0x20] sm:$0xff]  ;;  %v1116_v24 = vld [vmem:[#allocation7 + $0x18] sm:$0xff]  ;;  %v1095_v25 = vld [vmem:[%s1518_s28 + $0x30] sm:$0xff]  ;;  %p1324_p9 = por %p1323_p2, %p1322_p11 }
  0x38   : > { %478 = vmatpush.bf16.msra.mxu0 %v1110_v2  ;;  %1124 = vmatpush.bf16.msra.mxu2 %v1110_v2  ;;  %v1103_v26 = vld [vmem:[%s1518_s28 + $0x70] sm:$0xff]  ;;  %v1114_v28 = vld [vmem:[#allocation7 + $0x8] sm:$0xff]  ;;  %v1113_v29 = vld [vmem:[#allocation7] sm:$0xff]  ;;  %p1320_p8 = pneg %p1319_p4 }
  0x39   : > { %v1115_v27 = vld [vmem:[#allocation7 + $0x10] sm:$0xff]  ;;  %v1096_v30 = vld [vmem:[%s1518_s28 + $0x38] sm:$0xff]  ;;  %v1547_v33 = vld [vmem:[%s1689_s2] ss:$0 sm:$0xff] }
  0x3a   : > { %v1104_v31 = vld [vmem:[%s1518_s28 + $0x78] sm:$0xff]  ;;  %p1325_p10 = pnand %p1324_p9, %p1320_p8 }
  0x3b   : > { %682 = vmatpush.bf16.msra.mxu1 %v1119_v21  ;;  %1131 = vmatpush.bf16.msra.mxu3 %v1119_v21 }
  0x3c   : > { %479 = vmatpush.bf16.msra.mxu0 %v1109_v3  ;;  %1125 = vmatpush.bf16.msra.mxu2 %v1109_v3 }
  0x3f   : > { %683 = vmatpush.bf16.msra.mxu1 %v1118_v22  ;;  %1132 = vmatpush.bf16.msra.mxu3 %v1118_v22 }
  0x40   : > { %480 = vmatpush.bf16.msra.mxu0 %v1108_v4  ;;  %1126 = vmatpush.bf16.msra.mxu2 %v1108_v4 }
  0x43   : > { %684 = vmatpush.bf16.msra.mxu1 %v1117_v23  ;;  %1133 = vmatpush.bf16.msra.mxu3 %v1117_v23 }
  0x44   : > { %481 = vmatpush.bf16.msra.mxu0 %v1107_v5  ;;  %1127 = vmatpush.bf16.msra.mxu2 %v1107_v5 }
  0x47   : > { %685 = vmatpush.bf16.msra.mxu1 %v1116_v24  ;;  %1134 = vmatpush.bf16.msra.mxu3 %v1116_v24 }
  0x48   : > { %482 = vmatpush.bf16.msra.mxu0 %v1106_v6  ;;  %1128 = vmatpush.bf16.msra.mxu2 %v1106_v6 }
  0x4b   : > { %686 = vmatpush.bf16.msra.mxu1 %v1115_v27  ;;  %1135 = vmatpush.bf16.msra.mxu3 %v1115_v27 }
  0x4c   : > { %483 = vmatpush.bf16.msra.mxu0 %v1105_v7  ;;  %1129 = vmatpush.bf16.msra.mxu2 %v1105_v7 }
  0x4f   : > { %484 = vmatmul.bf16.vlgmr.msra.gmra.mxu0 %v1089_v8  ;;  %524 = vmatmul.bf16.vlgmr.msra.gmra.mxu2 %v1097_v9 }
  0x50   : > { %687 = vmatpush.bf16.msra.mxu1 %v1114_v28  ;;  %1136 = vmatpush.bf16.msra.mxu3 %v1114_v28 }
  0x54   : > { %688 = vmatpush.bf16.msra.mxu1 %v1113_v29  ;;  %1137 = vmatpush.bf16.msra.mxu3 %v1113_v29 }
  0x5f   : > { %489 = vmatmul.bf16.gmra.mxu0 %v1090_v10  ;;  %529 = vmatmul.bf16.gmra.mxu2 %v1098_v11 }
  0x6f   : > { %494 = vmatmul.bf16.gmra.mxu0 %v1091_v12  ;;  %534 = vmatmul.bf16.gmra.mxu2 %v1099_v13 }
  0x7f   : > { %499 = vmatmul.bf16.gmra.mxu0 %v1092_v14  ;;  %539 = vmatmul.bf16.gmra.mxu2 %v1100_v15 }
  0x8f   : > { %504 = vmatmul.bf16.gmra.mxu0 %v1093_v16  ;;  %544 = vmatmul.bf16.gmra.mxu2 %v1101_v17 }
  0x9f   : > { %509 = vmatmul.bf16.gmra.mxu0 %v1094_v19  ;;  %549 = vmatmul.bf16.gmra.mxu2 %v1102_v20 }
  0xaf   : > { %514 = vmatmul.bf16.gmra.mxu0 %v1095_v25  ;;  %554 = vmatmul.bf16.gmra.mxu2 %v1103_v26 }
  0xbf   : > { %519 = vmatmul.bf16.gmra.mxu0 %v1096_v30  ;;  %559 = vmatmul.bf16.gmra.mxu2 %v1104_v31 }
  0xcc   : > { %v485_v32 = vpop.f32.mrf.mxu0 }
  0xcd   : > { %v486_v34 = vadd.f32 %v1547_v33, %v485_v32 }
  0xcf   : > { %v565_v37 = vmax.f32 %v486_v34, 0.0 }
  0xd2   : > { %v525_v35 = vpop.f32.mrf.mxu2 }
  0xd3   : > { %v526_v40 = vadd.f32 %v1547_v33, %v525_v35 }
  0xd4   : > { %v487_v36 = vpop.f32.mrf.mxu0 }
  0xd5   : > { %v488_v38 = vadd.f32 %v1547_v33, %v487_v36  ;;  %v581_v45 = vmax.f32 %v526_v40, 0.0 }
  0xd7   : > { %v566_v39 = vmax.f32 %v488_v38, 0.0 }
  0xd9   : > { %v597_v41 = vpack.c.bf16 %v566_v39, %v565_v37 }
  0xda   : > { %v527_v42 = vpop.f32.mrf.mxu2 }
  0xdb   : > { %v528_v43 = vadd.f32 %v1547_v33, %v527_v42  ;;  %689 = vmatmul.bf16.vlgmr.msra.gmra.mxu1 %v597_v41 }
  0xdc   : > { %v490_v44 = vpop.f32.mrf.mxu0 }
  0xdd   : > { %v582_v46 = vmax.f32 %v528_v43, 0.0  ;;  %v491_v48 = vadd.f32 %v1547_v33, %v490_v44 }
  0xdf   : > { %v605_v47 = vpack.c.bf16 %v582_v46, %v581_v45  ;;  %v567_v51 = vmax.f32 %v491_v48, 0.0 }
  0xe1   : > { %729 = vmatmul.bf16.vlgmr.msra.gmra.mxu3 %v605_v47 }
  0xe2   : > { %v530_v49 = vpop.f32.mrf.mxu2 }
  0xe3   : > { %v531_v54 = vadd.f32 %v1547_v33, %v530_v49 }
  0xe4   : > { %v492_v50 = vpop.f32.mrf.mxu0 }
  0xe5   : > { %v493_v52 = vadd.f32 %v1547_v33, %v492_v50  ;;  %v583_v59 = vmax.f32 %v531_v54, 0.0 }
  0xe7   : > { %v568_v53 = vmax.f32 %v493_v52, 0.0 }
  0xe9   : > { %v598_v55 = vpack.c.bf16 %v568_v53, %v567_v51 }
  0xea   : > { %v532_v56 = vpop.f32.mrf.mxu2 }
  0xeb   : > { %v533_v57 = vadd.f32 %v1547_v33, %v532_v56  ;;  %694 = vmatmul.bf16.gmra.mxu1 %v598_v55 }
  0xec   : > { %v495_v58 = vpop.f32.mrf.mxu0 }
  0xed   : > { %v584_v60 = vmax.f32 %v533_v57, 0.0  ;;  %v496_v62 = vadd.f32 %v1547_v33, %v495_v58 }
  0xef   : > { %v606_v61 = vpack.c.bf16 %v584_v60, %v583_v59  ;;  %v569_v1 = vmax.f32 %v496_v62, 0.0 }
  0xf1   : > { %734 = vmatmul.bf16.gmra.mxu3 %v606_v61 }
  0xf2   : > { %v535_v63 = vpop.f32.mrf.mxu2 }
  0xf3   : > { %v536_v4 = vadd.f32 %v1547_v33, %v535_v63 }
  0xf4   : > { %v497_v0 = vpop.f32.mrf.mxu0 }
  0xf5   : > { %v498_v2 = vadd.f32 %v1547_v33, %v497_v0  ;;  %v585_v9 = vmax.f32 %v536_v4, 0.0 }
  0xf7   : > { %v570_v3 = vmax.f32 %v498_v2, 0.0 }
  0xf9   : > { %v599_v5 = vpack.c.bf16 %v570_v3, %v569_v1 }
  0xfa   : > { %v537_v6 = vpop.f32.mrf.mxu2 }
  0xfb   : > { %v538_v7 = vadd.f32 %v1547_v33, %v537_v6  ;;  %699 = vmatmul.bf16.gmra.mxu1 %v599_v5 }
  0xfc   : > { %v500_v8 = vpop.f32.mrf.mxu0 }
  0xfd   : > { %v586_v10 = vmax.f32 %v538_v7, 0.0  ;;  %v501_v12 = vadd.f32 %v1547_v33, %v500_v8 }
  0xff   : > { %v607_v11 = vpack.c.bf16 %v586_v10, %v585_v9  ;;  %v571_v15 = vmax.f32 %v501_v12, 0.0 }
 0x101   : > { %739 = vmatmul.bf16.gmra.mxu3 %v607_v11 }
 0x102   : > { %v540_v13 = vpop.f32.mrf.mxu2 }
 0x103   : > { %v541_v18 = vadd.f32 %v1547_v33, %v540_v13 }
 0x104   : > { %v502_v14 = vpop.f32.mrf.mxu0 }
 0x105   : > { %v503_v16 = vadd.f32 %v1547_v33, %v502_v14  ;;  %v587_v23 = vmax.f32 %v541_v18, 0.0  ;;  %v1584_v18 = vld [vmem:[%s1691_s4] ss:$0 sm:$0xff] }
 0x107   : > { %v572_v17 = vmax.f32 %v503_v16, 0.0 }
 0x109   : > { %v600_v19 = vpack.c.bf16 %v572_v17, %v571_v15 }
 0x10a   : > { %v542_v20 = vpop.f32.mrf.mxu2 }
 0x10b   : > { %v543_v21 = vadd.f32 %v1547_v33, %v542_v20  ;;  %704 = vmatmul.bf16.gmra.mxu1 %v600_v19 }
 0x10c   : > { %v505_v22 = vpop.f32.mrf.mxu0 }
 0x10d   : > { %v588_v24 = vmax.f32 %v543_v21, 0.0  ;;  %v506_v26 = vadd.f32 %v1547_v33, %v505_v22 }
 0x10f   : > { %v608_v25 = vpack.c.bf16 %v588_v24, %v587_v23  ;;  %v573_v29 = vmax.f32 %v506_v26, 0.0 }
 0x111   : > { %744 = vmatmul.bf16.gmra.mxu3 %v608_v25 }
 0x112   : > { %v545_v27 = vpop.f32.mrf.mxu2 }
 0x113   : > { %v546_v32 = vadd.f32 %v1547_v33, %v545_v27 }
 0x114   : > { %v507_v28 = vpop.f32.mrf.mxu0 }
 0x115   : > { %v508_v30 = vadd.f32 %v1547_v33, %v507_v28  ;;  %v589_v38 = vmax.f32 %v546_v32, 0.0 }
 0x117   : > { %v574_v31 = vmax.f32 %v508_v30, 0.0 }
 0x119   : > { %v601_v34 = vpack.c.bf16 %v574_v31, %v573_v29 }
 0x11a   : > { %v547_v35 = vpop.f32.mrf.mxu2 }
 0x11b   : > { %v548_v36 = vadd.f32 %v1547_v33, %v547_v35  ;;  %709 = vmatmul.bf16.gmra.mxu1 %v601_v34 }
 0x11c   : > { %v510_v37 = vpop.f32.mrf.mxu0 }
 0x11d   : > { %v590_v39 = vmax.f32 %v548_v36, 0.0  ;;  %v511_v41 = vadd.f32 %v1547_v33, %v510_v37 }
 0x11f   : > { %v609_v40 = vpack.c.bf16 %v590_v39, %v589_v38  ;;  %v575_v44 = vmax.f32 %v511_v41, 0.0 }
 0x121   : > { %749 = vmatmul.bf16.gmra.mxu3 %v609_v40 }
 0x122   : > { %v550_v42 = vpop.f32.mrf.mxu2 }
 0x123   : > { %v551_v47 = vadd.f32 %v1547_v33, %v550_v42 }
 0x124   : > { %v512_v43 = vpop.f32.mrf.mxu0 }
 0x125   : > { %v513_v45 = vadd.f32 %v1547_v33, %v512_v43  ;;  %v591_v52 = vmax.f32 %v551_v47, 0.0 }
 0x127   : > { %v576_v46 = vmax.f32 %v513_v45, 0.0 }
 0x129   : > { %v602_v48 = vpack.c.bf16 %v576_v46, %v575_v44 }
 0x12a   : > { %v552_v49 = vpop.f32.mrf.mxu2 }
 0x12b   : > { %v553_v50 = vadd.f32 %v1547_v33, %v552_v49  ;;  %714 = vmatmul.bf16.gmra.mxu1 %v602_v48 }
 0x12c   : > { %v515_v51 = vpop.f32.mrf.mxu0 }
 0x12d   : > { %v592_v53 = vmax.f32 %v553_v50, 0.0  ;;  %v516_v55 = vadd.f32 %v1547_v33, %v515_v51 }
 0x12f   : > { %v610_v54 = vpack.c.bf16 %v592_v53, %v591_v52  ;;  %v577_v58 = vmax.f32 %v516_v55, 0.0 }
 0x131   : > { %754 = vmatmul.bf16.gmra.mxu3 %v610_v54 }
 0x132   : > { %v555_v56 = vpop.f32.mrf.mxu2 }
 0x133   : > { %v556_v61 = vadd.f32 %v1547_v33, %v555_v56 }
 0x134   : > { %v517_v57 = vpop.f32.mrf.mxu0 }
 0x135   : > { %v518_v59 = vadd.f32 %v1547_v33, %v517_v57  ;;  %v593_v2 = vmax.f32 %v556_v61, 0.0 }
 0x137   : > { %v578_v60 = vmax.f32 %v518_v59, 0.0 }
 0x139   : > { %v603_v62 = vpack.c.bf16 %v578_v60, %v577_v58 }
 0x13a   : > { %v557_v63 = vpop.f32.mrf.mxu2 }
 0x13b   : > { %v558_v0 = vadd.f32 %v1547_v33, %v557_v63  ;;  %719 = vmatmul.bf16.gmra.mxu1 %v603_v62 }
 0x13c   : > { %v520_v1 = vpop.f32.mrf.mxu0 }
 0x13d   : > { %v594_v3 = vmax.f32 %v558_v0, 0.0  ;;  %v521_v5 = vadd.f32 %v1547_v33, %v520_v1 }
 0x13f   : > { %v611_v4 = vpack.c.bf16 %v594_v3, %v593_v2  ;;  %v579_v8 = vmax.f32 %v521_v5, 0.0 }
 0x141   : > { %759 = vmatmul.bf16.gmra.mxu3 %v611_v4 }
 0x142   : > { %v560_v6 = vpop.f32.mrf.mxu2 }
 0x143   : > { %v561_v11 = vadd.f32 %v1547_v33, %v560_v6 }
 0x144   : > { %v522_v7 = vpop.f32.mrf.mxu0 }
 0x145   : > { %v523_v9 = vadd.f32 %v1547_v33, %v522_v7  ;;  %v595_v15 = vmax.f32 %v561_v11, 0.0 }
 0x147   : > { %v580_v10 = vmax.f32 %v523_v9, 0.0 }
 0x149   : > { %v604_v12 = vpack.c.bf16 %v580_v10, %v579_v8 }
 0x14a   : > { %v562_v13 = vpop.f32.mrf.mxu2 }
 0x14b   : > { %v563_v14 = vadd.f32 %v1547_v33, %v562_v13  ;;  %724 = vmatmul.bf16.gmra.mxu1 %v604_v12 }
 0x14d   : > { %v596_v16 = vmax.f32 %v563_v14, 0.0 }
 0x14f   : > { %v612_v17 = vpack.c.bf16 %v596_v16, %v595_v15 }
 0x151   : > { %764 = vmatmul.bf16.gmra.mxu3 %v612_v17 }
 0x158   : > { %v690_v19 = vpop.f32.mrf.mxu1 }
 0x159   : > { %v691_v20 = vadd.f32 %v1584_v18, %v690_v19 }
 0x15b   : > { %v770_v21 = vmax.f32 %v691_v20, 0.0 }
 0x15d   : > { %802 = vst [vmem:[%s1588_s13] sm:$0xff] %v770_v21 }
 0x160   : > { %v692_v33 = vpop.f32.mrf.mxu1 }
 0x161   : > { %v693_v22 = vadd.f32 %v1584_v18, %v692_v33 }
 0x163   : > { %v771_v23 = vmax.f32 %v693_v22, 0.0 }
 0x164   : > { %v730_v24 = vpop.f32.mrf.mxu3 }
 0x165   : > { %803 = vst [vmem:[%s1588_s13 + $0x8] sm:$0xff] %v771_v23  ;;  %v731_v25 = vadd.f32 %v1584_v18, %v730_v24 }
 0x167   : > { %v786_v26 = vmax.f32 %v731_v25, 0.0 }
 0x168   : > { %v695_v27 = vpop.f32.mrf.mxu1 }
 0x169   : > { %818 = vst [vmem:[%s1588_s13 + $0x80] sm:$0xff] %v786_v26  ;;  %v696_v28 = vadd.f32 %v1584_v18, %v695_v27 }
 0x16b   : > { %v772_v29 = vmax.f32 %v696_v28, 0.0 }
 0x16c   : > { %v732_v30 = vpop.f32.mrf.mxu3 }
 0x16d   : > { %804 = vst [vmem:[%s1588_s13 + $0x10] sm:$0xff] %v772_v29  ;;  %v733_v31 = vadd.f32 %v1584_v18, %v732_v30 }
 0x16f   : > { %v787_v32 = vmax.f32 %v733_v31, 0.0 }
 0x170   : > { %v697_v34 = vpop.f32.mrf.mxu1 }
 0x171   : > { %819 = vst [vmem:[%s1588_s13 + $0x88] sm:$0xff] %v787_v32  ;;  %v698_v35 = vadd.f32 %v1584_v18, %v697_v34 }
 0x173   : > { %v773_v36 = vmax.f32 %v698_v35, 0.0 }
 0x174   : > { %v735_v37 = vpop.f32.mrf.mxu3 }
 0x175   : > { %805 = vst [vmem:[%s1588_s13 + $0x18] sm:$0xff] %v773_v36  ;;  %v736_v38 = vadd.f32 %v1584_v18, %v735_v37 }
 0x177   : > { %v788_v39 = vmax.f32 %v736_v38, 0.0 }
 0x178   : > { %v700_v40 = vpop.f32.mrf.mxu1 }
 0x179   : > { %820 = vst [vmem:[%s1588_s13 + $0x90] sm:$0xff] %v788_v39  ;;  %v701_v41 = vadd.f32 %v1584_v18, %v700_v40 }
 0x17b   : > { %v774_v42 = vmax.f32 %v701_v41, 0.0 }
 0x17c   : > { %v737_v43 = vpop.f32.mrf.mxu3 }
 0x17d   : > { %806 = vst [vmem:[%s1588_s13 + $0x20] sm:$0xff] %v774_v42  ;;  %v738_v44 = vadd.f32 %v1584_v18, %v737_v43 }
 0x17f   : > { %v789_v45 = vmax.f32 %v738_v44, 0.0 }
 0x180   : > { %v702_v46 = vpop.f32.mrf.mxu1 }
 0x181   : > { %821 = vst [vmem:[%s1588_s13 + $0x98] sm:$0xff] %v789_v45  ;;  %v703_v47 = vadd.f32 %v1584_v18, %v702_v46 }
 0x183   : > { %v775_v48 = vmax.f32 %v703_v47, 0.0 }
 0x184   : > { %v740_v49 = vpop.f32.mrf.mxu3 }
 0x185   : > { %807 = vst [vmem:[%s1588_s13 + $0x28] sm:$0xff] %v775_v48  ;;  %v741_v50 = vadd.f32 %v1584_v18, %v740_v49 }
 0x187   : > { %v790_v51 = vmax.f32 %v741_v50, 0.0 }
 0x188   : > { %v705_v52 = vpop.f32.mrf.mxu1 }
 0x189   : > { %822 = vst [vmem:[%s1588_s13 + $0xa0] sm:$0xff] %v790_v51  ;;  %v706_v53 = vadd.f32 %v1584_v18, %v705_v52 }
 0x18b   : > { %v776_v54 = vmax.f32 %v706_v53, 0.0 }
 0x18c   : > { %v742_v55 = vpop.f32.mrf.mxu3 }
 0x18d   : > { %808 = vst [vmem:[%s1588_s13 + $0x30] sm:$0xff] %v776_v54  ;;  %v743_v56 = vadd.f32 %v1584_v18, %v742_v55 }
 0x18f   : > { %v791_v57 = vmax.f32 %v743_v56, 0.0 }
 0x190   : > { %v707_v58 = vpop.f32.mrf.mxu1 }
 0x191   : > { %823 = vst [vmem:[%s1588_s13 + $0xa8] sm:$0xff] %v791_v57  ;;  %v708_v59 = vadd.f32 %v1584_v18, %v707_v58 }
 0x193   : > { %v777_v60 = vmax.f32 %v708_v59, 0.0 }
 0x194   : > { %v745_v61 = vpop.f32.mrf.mxu3 }
 0x195   : > { %809 = vst [vmem:[%s1588_s13 + $0x38] sm:$0xff] %v777_v60  ;;  %v746_v62 = vadd.f32 %v1584_v18, %v745_v61 }
 0x197   : > { %v792_v63 = vmax.f32 %v746_v62, 0.0 }
 0x198   : > { %v710_v0 = vpop.f32.mrf.mxu1 }
 0x199   : > { %824 = vst [vmem:[%s1588_s13 + $0xb0] sm:$0xff] %v792_v63  ;;  %v711_v1 = vadd.f32 %v1584_v18, %v710_v0 }
 0x19b   : > { %v778_v2 = vmax.f32 %v711_v1, 0.0 }
 0x19c   : > { %v747_v3 = vpop.f32.mrf.mxu3 }
 0x19d   : > { %810 = vst [vmem:[%s1588_s13 + $0x40] sm:$0xff] %v778_v2  ;;  %v748_v4 = vadd.f32 %v1584_v18, %v747_v3 }
 0x19f   : > { %v793_v5 = vmax.f32 %v748_v4, 0.0 }
 0x1a0   : > { %v712_v6 = vpop.f32.mrf.mxu1 }
 0x1a1   : > { %825 = vst [vmem:[%s1588_s13 + $0xb8] sm:$0xff] %v793_v5  ;;  %v713_v7 = vadd.f32 %v1584_v18, %v712_v6 }
 0x1a3   : > { %v779_v8 = vmax.f32 %v713_v7, 0.0 }
 0x1a4   : > { %v750_v9 = vpop.f32.mrf.mxu3 }
 0x1a5   : > { %811 = vst [vmem:[%s1588_s13 + $0x48] sm:$0xff] %v779_v8  ;;  %v751_v10 = vadd.f32 %v1584_v18, %v750_v9 }
 0x1a7   : > { %v794_v11 = vmax.f32 %v751_v10, 0.0 }
 0x1a8   : > { %v715_v12 = vpop.f32.mrf.mxu1 }
 0x1a9   : > { %826 = vst [vmem:[%s1588_s13 + $0xc0] sm:$0xff] %v794_v11  ;;  %v716_v13 = vadd.f32 %v1584_v18, %v715_v12 }
 0x1ab   : > { %v780_v14 = vmax.f32 %v716_v13, 0.0 }
 0x1ac   : > { %v752_v15 = vpop.f32.mrf.mxu3 }
 0x1ad   : > { %812 = vst [vmem:[%s1588_s13 + $0x50] sm:$0xff] %v780_v14  ;;  %v753_v16 = vadd.f32 %v1584_v18, %v752_v15 }
 0x1af   : > { %v795_v17 = vmax.f32 %v753_v16, 0.0 }
 0x1b0   : > { %v717_v19 = vpop.f32.mrf.mxu1 }
 0x1b1   : > { %827 = vst [vmem:[%s1588_s13 + $0xc8] sm:$0xff] %v795_v17  ;;  %v718_v20 = vadd.f32 %v1584_v18, %v717_v19 }
 0x1b3   : > { %v781_v21 = vmax.f32 %v718_v20, 0.0 }
 0x1b4   : > { %v755_v33 = vpop.f32.mrf.mxu3 }
 0x1b5   : > { %813 = vst [vmem:[%s1588_s13 + $0x58] sm:$0xff] %v781_v21  ;;  %v756_v22 = vadd.f32 %v1584_v18, %v755_v33 }
 0x1b7   : > { %v796_v23 = vmax.f32 %v756_v22, 0.0 }
 0x1b8   : > { %v720_v24 = vpop.f32.mrf.mxu1 }
 0x1b9   : > { %828 = vst [vmem:[%s1588_s13 + $0xd0] sm:$0xff] %v796_v23  ;;  %v721_v25 = vadd.f32 %v1584_v18, %v720_v24 }
 0x1bb   : > { %v782_v26 = vmax.f32 %v721_v25, 0.0 }
 0x1bc   : > { %v757_v27 = vpop.f32.mrf.mxu3 }
 0x1bd   : > { %814 = vst [vmem:[%s1588_s13 + $0x60] sm:$0xff] %v782_v26  ;;  %v758_v28 = vadd.f32 %v1584_v18, %v757_v27 }
 0x1bf   : > { %v797_v29 = vmax.f32 %v758_v28, 0.0 }
 0x1c0   : > { %v722_v30 = vpop.f32.mrf.mxu1 }
 0x1c1   : > { %829 = vst [vmem:[%s1588_s13 + $0xd8] sm:$0xff] %v797_v29  ;;  %v723_v31 = vadd.f32 %v1584_v18, %v722_v30 }
 0x1c3   : > { %v783_v32 = vmax.f32 %v723_v31, 0.0 }
 0x1c4   : > { %v760_v34 = vpop.f32.mrf.mxu3 }
 0x1c5   : > { %815 = vst [vmem:[%s1588_s13 + $0x68] sm:$0xff] %v783_v32  ;;  %v761_v35 = vadd.f32 %v1584_v18, %v760_v34 }
 0x1c7   : > { %v798_v36 = vmax.f32 %v761_v35, 0.0 }
 0x1c8   : > { %v725_v37 = vpop.f32.mrf.mxu1 }
 0x1c9   : > { %830 = vst [vmem:[%s1588_s13 + $0xe0] sm:$0xff] %v798_v36  ;;  %v726_v38 = vadd.f32 %v1584_v18, %v725_v37 }
 0x1cb   : > { %v784_v39 = vmax.f32 %v726_v38, 0.0 }
 0x1cc   : > { %v762_v40 = vpop.f32.mrf.mxu3 }
 0x1cd   : > { %816 = vst [vmem:[%s1588_s13 + $0x70] sm:$0xff] %v784_v39  ;;  %v763_v41 = vadd.f32 %v1584_v18, %v762_v40 }
 0x1cf   : > { %v799_v42 = vmax.f32 %v763_v41, 0.0 }
 0x1d0   : > { %v727_v43 = vpop.f32.mrf.mxu1 }
 0x1d1   : > { %831 = vst [vmem:[%s1588_s13 + $0xe8] sm:$0xff] %v799_v42  ;;  %v728_v44 = vadd.f32 %v1584_v18, %v727_v43 }
 0x1d3   : > { %v785_v45 = vmax.f32 %v728_v44, 0.0 }
 0x1d4   : > { %v765_v46 = vpop.f32.mrf.mxu3 }
 0x1d5   : > { %817 = vst [vmem:[%s1588_s13 + $0x78] sm:$0xff] %v785_v45  ;;  %v766_v47 = vadd.f32 %v1584_v18, %v765_v46 }
 0x1d7   : > { %v800_v48 = vmax.f32 %v766_v47, 0.0 }
 0x1d9   : > { %832 = vst [vmem:[%s1588_s13 + $0xf0] sm:$0xff] %v800_v48 }
 0x1dc   : > { %v767_v49 = vpop.f32.mrf.mxu3 }
 0x1dd   : > { %v768_v50 = vadd.f32 %v1584_v18, %v767_v49 }
 0x1df   : > { %v801_v51 = vmax.f32 %v768_v50, 0.0 }
 0x1e1   : > { %833 = vst [vmem:[%s1588_s13 + $0xf8] sm:$0xff] %v801_v51 }
 0x1e2   : > { %1328 = shalt.err (!%p1325_p10)
}
 0x1e3   : > { %s1377_s8 = smov 128   ;;  %s1378_s12 = smov 8  }
 0x1e4   : > { %1148 = dma.vmem_to_hbm [thread:$0]  (%p1481_p3), %s848_s7, 4096, %s850_s26, %s835_s16, %s1377_s8, %s1377_s8, %s1378_s12  }
 0x1e5 PF: > { %s864_s13 = sand.u32 1, %s1359_s18   ;;  %p1700_p12 = scmp.ge.s32.totalorder %s1371_s21, 2 }
 0x1e6   : > { %s865_s15 = scalar_lea.sflag [#allocation4], %s864_s13 }
 0x1e7   : > { %p1162_p13 = pnand %p1700_p12, %p1444_p6 }
 0x1e9   : > { %p1163_p0 = pneg %p1162_p13 }
 0x1eb   : > { %1354 = dma.done.wait (%p1163_p0), %s865_s15, 4096  }
 0x1ec   : > { %1356 = vsyncadd (%p1163_p0), %s865_s15, 4294963200  ;;  %p19_p5 = scmp.ge.s32.totalorder %s1471_s14, 4   ;;  %s1701_s18 = smov %s1363_s19 }
 0x1ed   : > { %s1702_s19 = smov %s1367_s20  ;;  %s1703_s20 = smov %s1487_s23 }
 0x1ee   : > { %s1704_s21 = smov %s1471_s14  ;;  %21 = sbr.rel (!%p19_p5) target bundleno = 6 (0x6), region = 93 }
 0x1f3   :  { %871 = vsyncpa [#allocation3], 1 }
 0x1f4   :  { %873 = vsyncpa [#allocation3 + $0x1], 1 }
 0x1f5   :  { %874 = vsyncpa [#allocation6], 1 }
 0x1f6   :  { %875 = vsyncpa [#allocation4], 1 }
 0x1f7   :  { %877 = vsyncpa [#allocation4 + $0x1], 1 }

</bundles_post_ra>
